<compile_context>
chip_gen: v7x
topology: tpu7x:2x2x1
jax: 0.10.0
libtpu: 0.0.40
codegen_flags: <defaults>
</compile_context>

<pallas_src>
import functools
import math

import jax
import jax.numpy as jnp
from jax.experimental import pallas as pl
from jax.experimental.pallas import tpu as pltpu

_MIB = 1024 * 1024
_MAX_PACK_GROUPS = 16        # unroll bound for the per-group loop
_MAX_PACKED_WIDTH = 4096     # keep packed rows at a sane lane width
_TARGET_BLOCK_BYTES = 8 * _MIB


def _layernorm_kernel(x_ref, a_ref, b_ref, o_ref, *, eps, features, groups):
    """One tile of packed LayerNorm rows (`groups` logical rows per physical row).

    x_ref/o_ref: (row_tile, groups*features) -- lane-dense when packed.
    a_ref/b_ref: (1, groups*features), already f32, already tiled.
    """
    f = jnp.float32(features)
    nm1 = jnp.float32(features - 1)          # torch.std is unbiased (ddof=1)
    epsf = jnp.float32(eps)

    x = x_ref[...].astype(jnp.float32)
    a = a_ref[...]
    b = b_ref[...]

    for g in range(groups):                  # static unroll; groups <= 16
        sl = slice(g * features, (g + 1) * features)
        xg = x[:, sl]                        # (row_tile, features), static lane slice
        # One-pass sum / sum-of-squares: the two cross-lane reduces are
        # independent (no serial mean -> diff -> reduce chain).
        s = jnp.sum(xg, axis=-1, keepdims=True)
        ss = jnp.sum(xg * xg, axis=-1, keepdims=True)
        mean = s / f
        var = jnp.maximum((ss - f * mean * mean) / nm1, 0.0)
        inv = 1.0 / (jnp.sqrt(var) + epsf)   # exact divide: keep the torch match
        yg = a[:, sl] * ((xg - mean) * inv) + b[:, sl]
        o_ref[:, sl] = yg.astype(o_ref.dtype)


def _round_up(x, m):
    return ((x + m - 1) // m) * m


def _vmem_budget_bytes():
    """(tile-sizing budget, ~physical VMEM) for the current TPU generation."""
    phys = 64 * _MIB                         # conservative fallback (v7x-sized)
    try:
        info = pltpu.get_tpu_info()
        phys = int(getattr(info, "vmem_capacity_bytes", phys)) or phys
    except Exception:
        pass
    # ~Half of physical minus headroom: ~60 MiB on v5e/v6e (128 MiB physical),
    # ~28 MiB on v7x (64 MiB physical).
    budget = min(max(phys // 2 - 4 * _MIB, 16 * _MIB), 64 * _MIB)
    return budget, phys


def _per_row_bytes(width, in_itemsize, out_itemsize):
    # 2 double-buffered input blocks + 2 output blocks + ~4 f32 tile-sized
    # temporaries created by the in-kernel f32 upcast / elementwise chain.
    return width * (2 * in_itemsize + 2 * out_itemsize + 4 * 4)


def _pick_row_tile(rows_packed, width, in_itemsize, out_itemsize, budget):
    per_row = max(_per_row_bytes(width, in_itemsize, out_itemsize), 1)
    tile = budget // per_row
    # Target ~8 MiB HBM-facing input blocks (amortizes the ~0.35us/step cost).
    tile = min(tile, max(_TARGET_BLOCK_BYTES // max(width * in_itemsize, 1), 1))
    # Keep >= 4 grid steps when rows permit (>= 2 per TensorCore on v7x).
    if rows_packed >= 4 * 8:
        tile = min(tile, _round_up(pl.cdiv(rows_packed, 4), 8))
    if tile >= rows_packed:
        return rows_packed                   # single full-extent block (always legal)
    return max(8, (tile // 8) * 8)           # sublane aligned


def _vmem_limit_bytes(row_tile, width, in_itemsize, out_itemsize, budget, phys):
    est = row_tile * _per_row_bytes(width, in_itemsize, out_itemsize) + 2 * _MIB
    # TODO(synk): for ultra-wide feature dims (minimum 8-row block exceeding
    # physical VMEM) a feature-axis "arbitrary" grid with sum/sumsq accumulators
    # would be needed; here we only raise the limit toward physical.
    return int(min(max(budget, est), max(phys - 8 * _MIB, 16 * _MIB)))


def layer_norm_pallas(x, a_2, b_2, eps=1e-6, *, row_tile=None):
    """LayerNorm over the last axis of x (any leading shape)."""
    orig_shape = x.shape
    features = orig_shape[-1]
    out_dtype = x.dtype
    x2d = x.reshape(-1, features)
    rows = x2d.shape[0]

    # Lane-dense packing factor: fold `groups` logical rows into one packed row
    # whose width is a multiple of 128 (e.g. F=32 -> groups=4 -> width 128).
    groups = 1
    if features % 128 != 0:
        g = 128 // math.gcd(features, 128)
        if 1 < g <= _MAX_PACK_GROUPS and g * features <= _MAX_PACKED_WIDTH:
            groups = g
    width = groups * features

    rows_p = _round_up(rows, groups)
    if rows_p != rows:
        # Zero rows normalize to b_2 (finite); they are sliced off below.
        x2d = jnp.pad(x2d, ((0, rows_p - rows), (0, 0)))
    rows_packed = rows_p // groups
    xp = x2d.reshape(rows_packed, width)

    # Cast/tile the affine params once in the wrapper (invariant operands).
    a2d = jnp.tile(a_2.reshape(1, features).astype(jnp.float32), (1, groups))
    b2d = jnp.tile(b_2.reshape(1, features).astype(jnp.float32), (1, groups))

    budget, phys = _vmem_budget_bytes()
    in_item = jnp.dtype(x.dtype).itemsize
    out_item = jnp.dtype(out_dtype).itemsize
    if row_tile is None:
        row_tile = _pick_row_tile(rows_packed, width, in_item, out_item, budget)
    vmem_limit = _vmem_limit_bytes(row_tile, width, in_item, out_item, budget, phys)

    grid = (pl.cdiv(rows_packed, row_tile),)
    kernel = functools.partial(_layernorm_kernel, eps=eps, features=features,
                               groups=groups)

    outp = pl.pallas_call(
        kernel,
        out_shape=jax.ShapeDtypeStruct((rows_packed, width), out_dtype),
        grid_spec=pltpu.PrefetchScalarGridSpec(
            num_scalar_prefetch=0,
            grid=grid,
            in_specs=[
                pl.BlockSpec((row_tile, width), lambda i: (i, 0)),
                pl.BlockSpec((1, width), lambda i: (0, 0)),
                pl.BlockSpec((1, width), lambda i: (0, 0)),
            ],
            out_specs=pl.BlockSpec((row_tile, width), lambda i: (i, 0)),
        ),
        compiler_params=pltpu.CompilerParams(
            dimension_semantics=("parallel",),
            vmem_limit_bytes=vmem_limit,
        ),
    )(xp, a2d, b2d)

    out2d = outp.reshape(rows_p, features)
    if rows_p != rows:
        out2d = out2d[:rows]
    return out2d.reshape(orig_shape)


def layer_norm_ref(x, a_2, b_2, eps=1e-6):
    """Pure-JAX reference mirroring the PyTorch module."""
    xf = x.astype(jnp.float32)
    mean = jnp.mean(xf, axis=-1, keepdims=True)
    std = jnp.std(xf, axis=-1, keepdims=True, ddof=1)   # unbiased, like torch
    return (a_2 * (xf - mean) / (std + eps) + b_2).astype(x.dtype)


if __name__ == "__main__":
    key = jax.random.PRNGKey(0)
    k1, k2, k3 = jax.random.split(key, 3)

    # Parameters matching nn.Parameter(torch.ones/zeros(features)).
    features = 32
    a_2 = jnp.ones((features,), dtype=jnp.float32)
    b_2 = jnp.zeros((features,), dtype=jnp.float32)

    # Case 1: batch=2, seq=8, hidden=32 -> packed path (groups=4), even rows.
    x1 = jax.random.normal(k1, (2, 8, features), dtype=jnp.float32)
    out1 = jax.block_until_ready(layer_norm_pallas(x1, a_2, b_2, eps=1e-6))
    ref1 = layer_norm_ref(x1, a_2, b_2, eps=1e-6)
    assert out1.shape == x1.shape
    assert jnp.allclose(out1, ref1, atol=2e-5, rtol=2e-5), "mismatch (packed even)"

    # Case 2: 15 rows -> exercises the rows % groups pad-and-slice path.
    x2 = jax.random.normal(k2, (3, 5, features), dtype=jnp.float32)
    out2 = jax.block_until_ready(layer_norm_pallas(x2, a_2, b_2, eps=1e-6))
    ref2 = layer_norm_ref(x2, a_2, b_2, eps=1e-6)
    assert out2.shape == x2.shape
    assert jnp.allclose(out2, ref2, atol=2e-5, rtol=2e-5), "mismatch (packed ragged)"

    # Case 3: hidden=128 -> already lane-dense (groups=1) path.
    f3 = 128
    a3 = jnp.ones((f3,), dtype=jnp.float32)
    b3 = jnp.zeros((f3,), dtype=jnp.float32)
    x3 = jax.random.normal(k3, (2, 8, f3), dtype=jnp.float32)
    out3 = jax.block_until_ready(layer_norm_pallas(x3, a3, b3, eps=1e-6))
    ref3 = layer_norm_ref(x3, a3, b3, eps=1e-6)
    assert out3.shape == x3.shape
    assert jnp.allclose(out3, ref3, atol=2e-5, rtol=2e-5), "mismatch (dense)"

    print("KERNEL_OK")
</pallas_src>

<mosaic_0001>
module attributes {stable_mosaic.version = 11 : i64} {
  func.func @_layernorm_kernel(%arg0: i32, %arg1: memref<4x128xf32, #tpu.memory_space<vmem>>, %arg2: memref<1x128xf32, #tpu.memory_space<vmem>>, %arg3: memref<1x128xf32, #tpu.memory_space<vmem>>, %arg4: memref<4x128xf32, #tpu.memory_space<vmem>>) attributes {dimension_semantics = [#tpu.dimension_semantics<parallel>], iteration_bounds = array<i64: 1>, scalar_prefetch = 0 : i64, scratch_operands = 0 : i64, tpu.core_type = #tpu.core_type<tc>, window_params = [{transform_indices = @transform_0, window_bounds = array<i64: 4, 128>}, {pipeline_mode = #tpu.pipeline_mode<synchronous>, transform_indices = @transform_1, window_bounds = array<i64: 1, 128>}, {pipeline_mode = #tpu.pipeline_mode<synchronous>, transform_indices = @transform_2, window_bounds = array<i64: 1, 128>}, {transform_indices = @transform_3, window_bounds = array<i64: 4, 128>}]} {
    %c0 = arith.constant 0 : index
    %c0_0 = arith.constant 0 : index
    %0 = vector.load %arg1[%c0, %c0_0] : memref<4x128xf32, #tpu.memory_space<vmem>>, vector<4x128xf32>
    %c0_1 = arith.constant 0 : index
    %c0_2 = arith.constant 0 : index
    %1 = vector.load %arg2[%c0_1, %c0_2] : memref<1x128xf32, #tpu.memory_space<vmem>>, vector<1x128xf32>
    %c0_3 = arith.constant 0 : index
    %c0_4 = arith.constant 0 : index
    %2 = vector.load %arg3[%c0_3, %c0_4] : memref<1x128xf32, #tpu.memory_space<vmem>>, vector<1x128xf32>
    %3 = vector.extract_strided_slice %0 {offsets = [0, 0], sizes = [4, 32], strides = [1, 1]} : vector<4x128xf32> to vector<4x32xf32>
    %cst = arith.constant dense<0.000000e+00> : vector<4xf32>
    %4 = vector.multi_reduction <add>, %3, %cst [1] : vector<4x32xf32> to vector<4xf32>
    %5 = vector.shape_cast %4 : vector<4xf32> to vector<4x1xf32>
    %6 = arith.mulf %3, %3 : vector<4x32xf32>
    %cst_5 = arith.constant dense<0.000000e+00> : vector<4xf32>
    %7 = vector.multi_reduction <add>, %6, %cst_5 [1] : vector<4x32xf32> to vector<4xf32>
    %8 = vector.shape_cast %7 : vector<4xf32> to vector<4x1xf32>
    %cst_6 = arith.constant 3.200000e+01 : f32
    %9 = vector.broadcast %cst_6 : f32 to vector<4x1xf32>
    %10 = arith.divf %5, %9 : vector<4x1xf32>
    %cst_7 = arith.constant 3.200000e+01 : f32
    %11 = vector.broadcast %cst_7 : f32 to vector<4x1xf32>
    %12 = arith.mulf %11, %10 : vector<4x1xf32>
    %13 = arith.mulf %12, %10 : vector<4x1xf32>
    %14 = arith.subf %8, %13 : vector<4x1xf32>
    %cst_8 = arith.constant 3.100000e+01 : f32
    %15 = vector.broadcast %cst_8 : f32 to vector<4x1xf32>
    %16 = arith.divf %14, %15 : vector<4x1xf32>
    %cst_9 = arith.constant 0.000000e+00 : f32
    %17 = vector.broadcast %cst_9 : f32 to vector<4x1xf32>
    %18 = arith.maximumf %16, %17 : vector<4x1xf32>
    %19 = math.sqrt %18 : vector<4x1xf32>
    %cst_10 = arith.constant 9.99999997E-7 : f32
    %20 = vector.broadcast %cst_10 : f32 to vector<4x1xf32>
    %21 = arith.addf %19, %20 : vector<4x1xf32>
    %cst_11 = arith.constant 1.000000e+00 : f32
    %22 = vector.broadcast %cst_11 : f32 to vector<4x1xf32>
    %23 = arith.divf %22, %21 : vector<4x1xf32>
    %24 = vector.extract_strided_slice %1 {offsets = [0, 0], sizes = [1, 32], strides = [1, 1]} : vector<1x128xf32> to vector<1x32xf32>
    %25 = vector.broadcast %10 : vector<4x1xf32> to vector<4x32xf32>
    %26 = arith.subf %3, %25 : vector<4x32xf32>
    %27 = vector.broadcast %23 : vector<4x1xf32> to vector<4x32xf32>
    %28 = arith.mulf %26, %27 : vector<4x32xf32>
    %29 = vector.broadcast %24 : vector<1x32xf32> to vector<4x32xf32>
    %30 = arith.mulf %29, %28 : vector<4x32xf32>
    %31 = vector.extract_strided_slice %2 {offsets = [0, 0], sizes = [1, 32], strides = [1, 1]} : vector<1x128xf32> to vector<1x32xf32>
    %32 = vector.broadcast %31 : vector<1x32xf32> to vector<4x32xf32>
    %33 = arith.addf %30, %32 : vector<4x32xf32>
    %c0_12 = arith.constant 0 : index
    %c0_13 = arith.constant 0 : index
    %34 = vector.load %arg4[%c0_12, %c0_13] : memref<4x128xf32, #tpu.memory_space<vmem>>, vector<4x32xf32>
    tpu.vector_store %arg4[%c0_12, %c0_13], %33 {strides = array<i32>} : memref<4x128xf32, #tpu.memory_space<vmem>>, vector<4x32xf32>,
    %35 = vector.extract_strided_slice %0 {offsets = [0, 32], sizes = [4, 32], strides = [1, 1]} : vector<4x128xf32> to vector<4x32xf32>
    %cst_14 = arith.constant dense<0.000000e+00> : vector<4xf32>
    %36 = vector.multi_reduction <add>, %35, %cst_14 [1] : vector<4x32xf32> to vector<4xf32>
    %37 = vector.shape_cast %36 : vector<4xf32> to vector<4x1xf32>
    %38 = arith.mulf %35, %35 : vector<4x32xf32>
    %cst_15 = arith.constant dense<0.000000e+00> : vector<4xf32>
    %39 = vector.multi_reduction <add>, %38, %cst_15 [1] : vector<4x32xf32> to vector<4xf32>
    %40 = vector.shape_cast %39 : vector<4xf32> to vector<4x1xf32>
    %cst_16 = arith.constant 3.200000e+01 : f32
    %41 = vector.broadcast %cst_16 : f32 to vector<4x1xf32>
    %42 = arith.divf %37, %41 : vector<4x1xf32>
    %cst_17 = arith.constant 3.200000e+01 : f32
    %43 = vector.broadcast %cst_17 : f32 to vector<4x1xf32>
    %44 = arith.mulf %43, %42 : vector<4x1xf32>
    %45 = arith.mulf %44, %42 : vector<4x1xf32>
    %46 = arith.subf %40, %45 : vector<4x1xf32>
    %cst_18 = arith.constant 3.100000e+01 : f32
    %47 = vector.broadcast %cst_18 : f32 to vector<4x1xf32>
    %48 = arith.divf %46, %47 : vector<4x1xf32>
    %cst_19 = arith.constant 0.000000e+00 : f32
    %49 = vector.broadcast %cst_19 : f32 to vector<4x1xf32>
    %50 = arith.maximumf %48, %49 : vector<4x1xf32>
    %51 = math.sqrt %50 : vector<4x1xf32>
    %cst_20 = arith.constant 9.99999997E-7 : f32
    %52 = vector.broadcast %cst_20 : f32 to vector<4x1xf32>
    %53 = arith.addf %51, %52 : vector<4x1xf32>
    %cst_21 = arith.constant 1.000000e+00 : f32
    %54 = vector.broadcast %cst_21 : f32 to vector<4x1xf32>
    %55 = arith.divf %54, %53 : vector<4x1xf32>
    %56 = vector.extract_strided_slice %1 {offsets = [0, 32], sizes = [1, 32], strides = [1, 1]} : vector<1x128xf32> to vector<1x32xf32>
    %57 = vector.broadcast %42 : vector<4x1xf32> to vector<4x32xf32>
    %58 = arith.subf %35, %57 : vector<4x32xf32>
    %59 = vector.broadcast %55 : vector<4x1xf32> to vector<4x32xf32>
    %60 = arith.mulf %58, %59 : vector<4x32xf32>
    %61 = vector.broadcast %56 : vector<1x32xf32> to vector<4x32xf32>
    %62 = arith.mulf %61, %60 : vector<4x32xf32>
    %63 = vector.extract_strided_slice %2 {offsets = [0, 32], sizes = [1, 32], strides = [1, 1]} : vector<1x128xf32> to vector<1x32xf32>
    %64 = vector.broadcast %63 : vector<1x32xf32> to vector<4x32xf32>
    %65 = arith.addf %62, %64 : vector<4x32xf32>
    %c0_22 = arith.constant 0 : index
    %c32 = arith.constant 32 : index
    %66 = vector.load %arg4[%c0_22, %c32] : memref<4x128xf32, #tpu.memory_space<vmem>>, vector<4x32xf32>
    tpu.vector_store %arg4[%c0_22, %c32], %65 {strides = array<i32>} : memref<4x128xf32, #tpu.memory_space<vmem>>, vector<4x32xf32>,
    %67 = vector.extract_strided_slice %0 {offsets = [0, 64], sizes = [4, 32], strides = [1, 1]} : vector<4x128xf32> to vector<4x32xf32>
    %cst_23 = arith.constant dense<0.000000e+00> : vector<4xf32>
    %68 = vector.multi_reduction <add>, %67, %cst_23 [1] : vector<4x32xf32> to vector<4xf32>
    %69 = vector.shape_cast %68 : vector<4xf32> to vector<4x1xf32>
    %70 = arith.mulf %67, %67 : vector<4x32xf32>
    %cst_24 = arith.constant dense<0.000000e+00> : vector<4xf32>
    %71 = vector.multi_reduction <add>, %70, %cst_24 [1] : vector<4x32xf32> to vector<4xf32>
    %72 = vector.shape_cast %71 : vector<4xf32> to vector<4x1xf32>
    %cst_25 = arith.constant 3.200000e+01 : f32
    %73 = vector.broadcast %cst_25 : f32 to vector<4x1xf32>
    %74 = arith.divf %69, %73 : vector<4x1xf32>
    %cst_26 = arith.constant 3.200000e+01 : f32
    %75 = vector.broadcast %cst_26 : f32 to vector<4x1xf32>
    %76 = arith.mulf %75, %74 : vector<4x1xf32>
    %77 = arith.mulf %76, %74 : vector<4x1xf32>
    %78 = arith.subf %72, %77 : vector<4x1xf32>
    %cst_27 = arith.constant 3.100000e+01 : f32
    %79 = vector.broadcast %cst_27 : f32 to vector<4x1xf32>
    %80 = arith.divf %78, %79 : vector<4x1xf32>
    %cst_28 = arith.constant 0.000000e+00 : f32
    %81 = vector.broadcast %cst_28 : f32 to vector<4x1xf32>
    %82 = arith.maximumf %80, %81 : vector<4x1xf32>
    %83 = math.sqrt %82 : vector<4x1xf32>
    %cst_29 = arith.constant 9.99999997E-7 : f32
    %84 = vector.broadcast %cst_29 : f32 to vector<4x1xf32>
    %85 = arith.addf %83, %84 : vector<4x1xf32>
    %cst_30 = arith.constant 1.000000e+00 : f32
    %86 = vector.broadcast %cst_30 : f32 to vector<4x1xf32>
    %87 = arith.divf %86, %85 : vector<4x1xf32>
    %88 = vector.extract_strided_slice %1 {offsets = [0, 64], sizes = [1, 32], strides = [1, 1]} : vector<1x128xf32> to vector<1x32xf32>
    %89 = vector.broadcast %74 : vector<4x1xf32> to vector<4x32xf32>
    %90 = arith.subf %67, %89 : vector<4x32xf32>
    %91 = vector.broadcast %87 : vector<4x1xf32> to vector<4x32xf32>
    %92 = arith.mulf %90, %91 : vector<4x32xf32>
    %93 = vector.broadcast %88 : vector<1x32xf32> to vector<4x32xf32>
    %94 = arith.mulf %93, %92 : vector<4x32xf32>
    %95 = vector.extract_strided_slice %2 {offsets = [0, 64], sizes = [1, 32], strides = [1, 1]} : vector<1x128xf32> to vector<1x32xf32>
    %96 = vector.broadcast %95 : vector<1x32xf32> to vector<4x32xf32>
    %97 = arith.addf %94, %96 : vector<4x32xf32>
    %c0_31 = arith.constant 0 : index
    %c64 = arith.constant 64 : index
    %98 = vector.load %arg4[%c0_31, %c64] : memref<4x128xf32, #tpu.memory_space<vmem>>, vector<4x32xf32>
    tpu.vector_store %arg4[%c0_31, %c64], %97 {strides = array<i32>} : memref<4x128xf32, #tpu.memory_space<vmem>>, vector<4x32xf32>,
    %99 = vector.extract_strided_slice %0 {offsets = [0, 96], sizes = [4, 32], strides = [1, 1]} : vector<4x128xf32> to vector<4x32xf32>
    %cst_32 = arith.constant dense<0.000000e+00> : vector<4xf32>
    %100 = vector.multi_reduction <add>, %99, %cst_32 [1] : vector<4x32xf32> to vector<4xf32>
    %101 = vector.shape_cast %100 : vector<4xf32> to vector<4x1xf32>
    %102 = arith.mulf %99, %99 : vector<4x32xf32>
    %cst_33 = arith.constant dense<0.000000e+00> : vector<4xf32>
    %103 = vector.multi_reduction <add>, %102, %cst_33 [1] : vector<4x32xf32> to vector<4xf32>
    %104 = vector.shape_cast %103 : vector<4xf32> to vector<4x1xf32>
    %cst_34 = arith.constant 3.200000e+01 : f32
    %105 = vector.broadcast %cst_34 : f32 to vector<4x1xf32>
    %106 = arith.divf %101, %105 : vector<4x1xf32>
    %cst_35 = arith.constant 3.200000e+01 : f32
    %107 = vector.broadcast %cst_35 : f32 to vector<4x1xf32>
    %108 = arith.mulf %107, %106 : vector<4x1xf32>
    %109 = arith.mulf %108, %106 : vector<4x1xf32>
    %110 = arith.subf %104, %109 : vector<4x1xf32>
    %cst_36 = arith.constant 3.100000e+01 : f32
    %111 = vector.broadcast %cst_36 : f32 to vector<4x1xf32>
    %112 = arith.divf %110, %111 : vector<4x1xf32>
    %cst_37 = arith.constant 0.000000e+00 : f32
    %113 = vector.broadcast %cst_37 : f32 to vector<4x1xf32>
    %114 = arith.maximumf %112, %113 : vector<4x1xf32>
    %115 = math.sqrt %114 : vector<4x1xf32>
    %cst_38 = arith.constant 9.99999997E-7 : f32
    %116 = vector.broadcast %cst_38 : f32 to vector<4x1xf32>
    %117 = arith.addf %115, %116 : vector<4x1xf32>
    %cst_39 = arith.constant 1.000000e+00 : f32
    %118 = vector.broadcast %cst_39 : f32 to vector<4x1xf32>
    %119 = arith.divf %118, %117 : vector<4x1xf32>
    %120 = vector.extract_strided_slice %1 {offsets = [0, 96], sizes = [1, 32], strides = [1, 1]} : vector<1x128xf32> to vector<1x32xf32>
    %121 = vector.broadcast %106 : vector<4x1xf32> to vector<4x32xf32>
    %122 = arith.subf %99, %121 : vector<4x32xf32>
    %123 = vector.broadcast %119 : vector<4x1xf32> to vector<4x32xf32>
    %124 = arith.mulf %122, %123 : vector<4x32xf32>
    %125 = vector.broadcast %120 : vector<1x32xf32> to vector<4x32xf32>
    %126 = arith.mulf %125, %124 : vector<4x32xf32>
    %127 = vector.extract_strided_slice %2 {offsets = [0, 96], sizes = [1, 32], strides = [1, 1]} : vector<1x128xf32> to vector<1x32xf32>
    %128 = vector.broadcast %127 : vector<1x32xf32> to vector<4x32xf32>
    %129 = arith.addf %126, %128 : vector<4x32xf32>
    %c0_40 = arith.constant 0 : index
    %c96 = arith.constant 96 : index
    %130 = vector.load %arg4[%c0_40, %c96] : memref<4x128xf32, #tpu.memory_space<vmem>>, vector<4x32xf32>
    tpu.vector_store %arg4[%c0_40, %c96], %129 {strides = array<i32>} : memref<4x128xf32, #tpu.memory_space<vmem>>, vector<4x32xf32>,
    return
  }
  func.func @transform_0(%arg0: i32) -> (i32, i32) {
    %c0_i32 = arith.constant 0 : i32
    %c0_i32_0 = arith.constant 0 : i32
    return %arg0, %c0_i32 : i32, i32
  }
  func.func @transform_1(%arg0: i32) -> (i32, i32) {
    %c0_i32 = arith.constant 0 : i32
    %c0_i32_0 = arith.constant 0 : i32
    %c0_i32_1 = arith.constant 0 : i32
    return %c0_i32, %c0_i32_0 : i32, i32
  }
  func.func @transform_2(%arg0: i32) -> (i32, i32) {
    %c0_i32 = arith.constant 0 : i32
    %c0_i32_0 = arith.constant 0 : i32
    %c0_i32_1 = arith.constant 0 : i32
    return %c0_i32, %c0_i32_0 : i32, i32
  }
  func.func @transform_3(%arg0: i32) -> (i32, i32) {
    %c0_i32 = arith.constant 0 : i32
    %c0_i32_0 = arith.constant 0 : i32
    return %arg0, %c0_i32 : i32, i32
  }
}

</mosaic_0001>

<bundles_post_ra>
// kernel: tpu_custom_call.1
= control target key start
LH: loop header
LB: loop body
LE: loop exit
PB: predicated region body
PF: predicated region fallthrough
CT: control target
= control target key end

     0   :  { %8 = vsyncpa [#allocation3], 0  ;;  %s351_s0 = inlined_call_operand.hbm [shape: f32[4,128], index: 0, kind: input, shape index: {}]   ;;  %s352_s1 = inlined_call_operand.vmem [shape: f32[1,128], index: 1, kind: input, shape index: {}]   ;;  %s353_s2 = inlined_call_operand.vmem [shape: f32[1,128], index: 2, kind: input, shape index: {}]   ;;  %s354_s3 = inlined_call_operand.hbm [shape: f32[4,128], index: 3, kind: output, shape index: {}]  }
   0x1   :  { %9 = vsyncpa [#allocation4], 0  ;;  %s263_s12 = smov [#allocation2]   ;;  %s215_s16 = scalar_lea.hbm %s351_s0, 64 }
   0x2   :  { %s16_s13 = sshll.u32 %s263_s12, 4  ;;  %p216_p0 = scmp.ne.s32.totalorder %s351_s0, %s215_s16  ;;  %s17_s13 = int_to_ptr.vmem [resolvable:$true] %s16_s13 }
   0x3   :  { %p219_p1 = scmp.lt.u32.totalorder %s215_s16, %s351_s0 }
   0x5   :  { %p221_p2 = pnand %p219_p1, %p216_p0 }
   0x7   :  { %224 = shalt.err (!%p221_p2)
}
   0x8   :  { %s225_s21 = scalar_lea.vmem %s17_s13, 64  ;;  %p230_p4 = scmp.lt.s32.totalorder %s17_s13, %s17_s13 }
   0x9   :  { %p226_p3 = scmp.ne.s32.totalorder %s17_s13, %s225_s21  ;;  %p231_p5 = scmp.lt.s32.totalorder %s225_s21, %s225_s21 }
   0xb   :  { %p232_p6 = por %p231_p5, %p230_p4 }
   0xd   :  { %p233_p7 = pnand %p232_p6, %p226_p3 }
   0xf   :  { %236 = shalt.err (!%p233_p7)
}
  0x10   :  { %19 = dma.hbm_to_vmem [thread:$0]  %s351_s0, 64, %s17_s13, [#allocation3]  }
  0x11   :  { %259 = dma.done.wait [#allocation3], 64  }
  0x12   :  { %260 = vsyncadd [#allocation3], 4294967232  ;;  %v300_v0 = vld [vmem:[#allocation2] sm:$0xf]  ;;  %s264_s24 = smov 96   ;;  %s265_s25 = smov 32  }
  0x13   :  { %74 = vrot.lane.b32.xlu0 %v300_v0, %s264_s24  ;;  %143 = vrot.lane.b32.xlu1 %v300_v0, %s265_s25  ;;  %v34_v1 = vmul.f32 %v300_v0, %v300_v0  ;;  %s266_s26 = smov 64   ;;  %vm30_vm0 = vcmask 257024   ;;  %v320_v32 = vld [vmem:[%s352_s1] ss:$0 sm:$0xff]  ;;  %vm107_vm9 = vcmask 519424   ;;  %vm141_vm10 = vcmask 781824  }
  0x14   :  { %v31_v2 = vsel %vm30_vm0, %v300_v0, 0.0  ;;  %v325_v34 = vld [vmem:[%s353_s2] ss:$0 sm:$0xff]  ;;  %s267_s1 = smov [#allocation5]   ;;  %vm175_vm11 = vcmask 1044224  }
  0x15   :  { %v35_v3 = vsel %vm30_vm0, %v34_v1, 0.0  ;;  %s183_s2 = sshll.u32 %s267_s1, 4  ;;  %s184_s2 = int_to_ptr.vmem [resolvable:$true] %s183_s2 }
  0x16   :  { %s237_s30 = scalar_lea.vmem %s184_s2, 64  ;;  %p242_p9 = scmp.lt.s32.totalorder %s184_s2, %s184_s2 }
  0x17   :  { %109 = vrot.lane.b32.xlu0 %v300_v0, %s266_s26  ;;  %81 = vrot.lane.b32.xlu1 %v34_v1, %s264_s24  ;;  %p238_p8 = scmp.ne.s32.totalorder %s184_s2, %s237_s30  ;;  %p243_p10 = scmp.lt.s32.totalorder %s237_s30, %s237_s30 }
  0x19   :  { %p244_p11 = por %p243_p10, %p242_p9 }
  0x1b   :  { %115 = vrot.lane.b32.xlu0 %v34_v1, %s266_s26  ;;  %149 = vrot.lane.b32.xlu1 %v34_v1, %s265_s25  ;;  %p245_p12 = pnand %p244_p11, %p238_p8 }
  0x3a   :  { %32 = vadd.xlane.f32.xlu0 %v31_v2 }
  0x3f   :  { %36 = vadd.xlane.f32.xlu1 %v35_v3 }
  0x85   :  { %v75_v4 = vpop.permute.xlu0 %74  ;;  %v144_v5 = vpop.permute.xlu1 %143 }
  0x86   :  { %v77_v6 = vsel %vm30_vm0, %v75_v4, 0.0  ;;  %v146_v13 = vsel %vm30_vm0, %v144_v5, 0.0 }
  0x87   :  { %78 = vadd.xlane.f32.xlu0 %v77_v6 }
  0x89   :  { %v110_v7 = vpop.permute.xlu0 %109  ;;  %v82_v8 = vpop.permute.xlu1 %81 }
  0x8a   :  { %v112_v9 = vsel %vm30_vm0, %v110_v7, 0.0  ;;  %v84_v10 = vsel %vm30_vm0, %v82_v8, 0.0 }
  0x8b   :  { %113 = vadd.xlane.f32.xlu1 %v112_v9  ;;  %85 = vadd.xlane.f32.xlu0 %v84_v10 }
  0x8d   :  { %v116_v11 = vpop.permute.xlu0 %115  ;;  %v150_v12 = vpop.permute.xlu1 %149 }
  0x8e   :  { %v118_v14 = vsel %vm30_vm0, %v116_v11, 0.0  ;;  %v152_v15 = vsel %vm30_vm0, %v150_v12, 0.0 }
  0x8f   :  { %147 = vadd.xlane.f32.xlu1 %v146_v13  ;;  %119 = vadd.xlane.f32.xlu0 %v118_v14 }
  0x93   :  { %153 = vadd.xlane.f32.xlu0 %v152_v15 }
  0xc7   :  { %v33_v16 = vpop.xlane.xlu0 %32 }
  0xc8   :  { %v39_v17 = vmul.f32 0.03125, %v33_v16 }
  0xca   :  { %v40_v18 = vmul.f32 32.0, %v39_v17  ;;  %v56_v30 = vsub.f32 %v300_v0, %v39_v17 }
  0xcc   :  { %v37_v19 = vpop.xlane.xlu1 %36  ;;  %v41_v20 = vmul.f32 %v40_v18, %v39_v17 }
  0xce   :  { %v42_v21 = vsub.f32 %v37_v19, %v41_v20 }
  0xd0   :  { %v44_v22 = vmul.f32 0.032258064, %v42_v21 }
  0xd2   :  { %v45_v23 = vmax.f32 %v44_v22, 0.0 }
  0xd4   :  { %199 = vrsqrt.f32 %v45_v23  ;;  %vm48_vm1 = vcmp.eq.f32.partialorder %v45_v23, inf  ;;  %v51_v25 = vand.u32 2147483648, %v45_v23  ;;  %vm50_vm2 = vcmp.eq.f32.partialorder %v45_v23, 0.0 }
  0xde   :  { %v200_v24 = vpop.eup %199 }
  0xdf   :  { %v47_v26 = vmul.f32 %v200_v24, %v45_v23 }
  0xe1   :  { %v49_v27 = vsel %vm48_vm1, %v45_v23, %v47_v26 }
  0xe2   :  { %v52_v28 = vsel %vm50_vm2, %v51_v25, %v49_v27 }
  0xe3   :  { %v53_v29 = vadd.f32 1e-06, %v52_v28 }
  0xe5   :  { %201 = vrcp.f32 %v53_v29 }
  0xef   :  { %v202_v31 = vpop.eup %201 }
  0xf0   :  { %v57_v33 = vmul.f32 %v202_v31, %v56_v30 }
  0xf2   :  { %v64_v35 = vmul.f32 %v320_v32, %v57_v33 }
  0xf4   :  { %v71_v36 = vadd.f32 %v325_v34, %v64_v35 }
  0xf6   :  { %72 = vst.msk [vmem:[#allocation5] sm:$0xf] %vm30_vm0, %v71_v36 }
 0x114   :  { %v79_v37 = vpop.xlane.xlu0 %78 }
 0x115   :  { %v87_v38 = vmul.f32 0.03125, %v79_v37 }
 0x117   :  { %v88_v39 = vmul.f32 32.0, %v87_v38  ;;  %v103_v16 = vsub.f32 %v300_v0, %v87_v38 }
 0x118   :  { %v114_v40 = vpop.xlane.xlu1 %113  ;;  %v86_v41 = vpop.xlane.xlu0 %85 }
 0x119   :  { %v121_v42 = vmul.f32 0.03125, %v114_v40  ;;  %v89_v43 = vmul.f32 %v88_v39, %v87_v38 }
 0x11b   :  { %v90_v44 = vsub.f32 %v86_v41, %v89_v43  ;;  %v122_v45 = vmul.f32 32.0, %v121_v42  ;;  %v137_v20 = vsub.f32 %v300_v0, %v121_v42 }
 0x11c   :  { %v148_v46 = vpop.xlane.xlu1 %147  ;;  %v120_v47 = vpop.xlane.xlu0 %119 }
 0x11d   :  { %v91_v48 = vmul.f32 0.032258064, %v90_v44  ;;  %v155_v49 = vmul.f32 0.03125, %v148_v46  ;;  %v123_v50 = vmul.f32 %v122_v45, %v121_v42 }
 0x11f   :  { %v92_v51 = vmax.f32 %v91_v48, 0.0  ;;  %v156_v52 = vmul.f32 32.0, %v155_v49  ;;  %v124_v53 = vsub.f32 %v120_v47, %v123_v50  ;;  %v171_v25 = vsub.f32 %v300_v0, %v155_v49 }
 0x120   :  { %v154_v54 = vpop.xlane.xlu0 %153 }
 0x121   :  { %203 = vrsqrt.f32 %v92_v51  ;;  %v125_v55 = vmul.f32 0.032258064, %v124_v53  ;;  %v157_v56 = vmul.f32 %v156_v52, %v155_v49  ;;  %vm95_vm3 = vcmp.eq.f32.partialorder %v92_v51, inf }
 0x122   :  { %v98_v63 = vand.u32 2147483648, %v92_v51  ;;  %vm97_vm4 = vcmp.eq.f32.partialorder %v92_v51, 0.0 }
 0x123   :  { %v126_v57 = vmax.f32 %v125_v55, 0.0  ;;  %v158_v58 = vsub.f32 %v154_v54, %v157_v56 }
 0x125   :  { %205 = vrsqrt.f32 %v126_v57  ;;  %v159_v59 = vmul.f32 0.032258064, %v158_v58  ;;  %vm129_vm5 = vcmp.eq.f32.partialorder %v126_v57, inf  ;;  %v132_v6 = vand.u32 2147483648, %v126_v57 }
 0x126   :  { %vm131_vm6 = vcmp.eq.f32.partialorder %v126_v57, 0.0 }
 0x127   :  { %v160_v60 = vmax.f32 %v159_v59, 0.0 }
 0x129   :  { %207 = vrsqrt.f32 %v160_v60  ;;  %vm163_vm7 = vcmp.eq.f32.partialorder %v160_v60, inf  ;;  %v166_v12 = vand.u32 2147483648, %v160_v60  ;;  %vm165_vm8 = vcmp.eq.f32.partialorder %v160_v60, 0.0 }
 0x12b   :  { %v204_v61 = vpop.eup %203 }
 0x12c   :  { %v94_v62 = vmul.f32 %v204_v61, %v92_v51 }
 0x12e   :  { %v96_v1 = vsel %vm95_vm3, %v92_v51, %v94_v62 }
 0x12f   :  { %v99_v2 = vsel %vm97_vm4, %v98_v63, %v96_v1  ;;  %v206_v3 = vpop.eup %205 }
 0x130   :  { %v100_v4 = vadd.f32 1e-06, %v99_v2  ;;  %v128_v5 = vmul.f32 %v206_v3, %v126_v57 }
 0x132   :  { %209 = vrcp.f32 %v100_v4  ;;  %v130_v7 = vsel %vm129_vm5, %v126_v57, %v128_v5 }
 0x133   :  { %v133_v8 = vsel %vm131_vm6, %v132_v6, %v130_v7  ;;  %v208_v9 = vpop.eup %207 }
 0x134   :  { %v134_v10 = vadd.f32 1e-06, %v133_v8  ;;  %v162_v11 = vmul.f32 %v208_v9, %v160_v60 }
 0x136   :  { %211 = vrcp.f32 %v134_v10  ;;  %v164_v13 = vsel %vm163_vm7, %v160_v60, %v162_v11 }
 0x137   :  { %v167_v14 = vsel %vm165_vm8, %v166_v12, %v164_v13 }
 0x138   :  { %v168_v15 = vadd.f32 1e-06, %v167_v14 }
 0x13a   :  { %213 = vrcp.f32 %v168_v15 }
 0x13c   :  { %v210_v17 = vpop.eup %209 }
 0x13d   :  { %v104_v18 = vmul.f32 %v210_v17, %v103_v16 }
 0x13f   :  { %v105_v19 = vmul.f32 %v320_v32, %v104_v18 }
 0x140   :  { %v212_v21 = vpop.eup %211 }
 0x141   :  { %v106_v22 = vadd.f32 %v325_v34, %v105_v19  ;;  %v138_v23 = vmul.f32 %v212_v21, %v137_v20 }
 0x143   :  { %108 = vst.msk [vmem:[#allocation5] sm:$0xf] %vm107_vm9, %v106_v22  ;;  %v139_v24 = vmul.f32 %v320_v32, %v138_v23 }
 0x144   :  { %v214_v26 = vpop.eup %213 }
 0x145   :  { %v140_v27 = vadd.f32 %v325_v34, %v139_v24  ;;  %v172_v28 = vmul.f32 %v214_v26, %v171_v25 }
 0x147   :  { %142 = vst.msk [vmem:[#allocation5] sm:$0xf] %vm141_vm10, %v140_v27  ;;  %v173_v29 = vmul.f32 %v320_v32, %v172_v28 }
 0x149   :  { %v174_v30 = vadd.f32 %v325_v34, %v173_v29 }
 0x14b   :  { %176 = vst.msk [vmem:[#allocation5] sm:$0xf] %vm175_vm11, %v174_v30 }
 0x14c   :  { %248 = shalt.err (!%p245_p12)
}
 0x14d   :  { %s249_s6 = scalar_lea.hbm %s354_s3, 64 }
 0x14e   :  { %p250_p13 = scmp.ne.s32.totalorder %s354_s3, %s249_s6  ;;  %p253_p0 = scmp.lt.u32.totalorder %s249_s6, %s354_s3 }
 0x150   :  { %p255_p1 = pnand %p253_p0, %p250_p13 }
 0x152   :  { %258 = shalt.err (!%p255_p1)
}
 0x153   :  { %186 = dma.vmem_to_hbm [thread:$0]  %s184_s2, 64, %s354_s3, [#allocation4]  }
 0x154   :  { %261 = dma.done.wait [#allocation4], 64  }
 0x155   :  { %262 = vsyncadd [#allocation4], 4294967232 }
 0x156   :  { %190 = vsyncpa [#allocation3], 1 }
 0x157   :  { %191 = vsyncpa [#allocation4], 1 }

</bundles_post_ra>
